<compile_context>
chip_gen: v7x
topology: tpu7x:2x2x1
jax: 0.10.0
libtpu: 0.0.40
codegen_flags: <defaults>
</compile_context>

<pallas_src>
import jax
import jax.numpy as jnp
from jax.experimental import pallas as pl
from jax.experimental.pallas import tpu as pltpu


LANE = 128                       # TPU lane width: pad K / C up to multiples of this
_VMEM_LIMIT = 64 * 1024 * 1024   # safe on v5e/v6e (128 MiB) and v7x (64 MiB physical)


def _rup(x, m):
    return ((x + m - 1) // m) * m


# ----------------------------------------------------------------------------
# Pallas kernels
# ----------------------------------------------------------------------------
def _make_conv_gn_kernel(channels_per_group, eps, relu, has_residual):
    """conv-as-matmul (bf16 MXU, f32 acc) + GroupNorm (+ residual) (+ ReLU)."""

    def kernel(*refs):
        if has_residual:
            x_ref, w_ref, g_ref, b_ref, m_ref, mt_ref, r_ref, out_ref = refs
        else:
            x_ref, w_ref, g_ref, b_ref, m_ref, mt_ref, out_ref = refs

        x = x_ref[0]            # (P, Kp)  bf16 im2col patches for this sample
        w = w_ref[...]          # (Kp, Cp) bf16 conv weight as a matrix
        # bf16 x bf16 -> f32 accumulate on the MXU.
        y = jnp.dot(x, w, preferred_element_type=jnp.float32)   # (P, Cp) f32

        P = y.shape[0]
        count = channels_per_group * P       # elements per (sample, group), real channels only

        # GroupNorm statistics in f32 without in-kernel reshapes:
        # per-channel sums -> per-group sums via a 0/1 membership matmul.
        # Padded channels have zero membership (and are exactly zero anyway).
        ch_sum = jnp.sum(y, axis=0, keepdims=True)          # (1, Cp)
        ch_sq = jnp.sum(y * y, axis=0, keepdims=True)       # (1, Cp)
        g_sum = jnp.dot(ch_sum, m_ref[...], preferred_element_type=jnp.float32)   # (1, G)
        g_sq = jnp.dot(ch_sq, m_ref[...], preferred_element_type=jnp.float32)     # (1, G)
        mean_g = g_sum / count
        var_g = g_sq / count - mean_g * mean_g              # biased variance (PyTorch GN)
        var_g = jnp.maximum(var_g, 0.0)                     # guard against cancellation
        # broadcast group stats back to channels
        mean_c = jnp.dot(mean_g, mt_ref[...], preferred_element_type=jnp.float32)  # (1, Cp)
        var_c = jnp.dot(var_g, mt_ref[...], preferred_element_type=jnp.float32)    # (1, Cp)

        inv = jax.lax.rsqrt(var_c + eps)
        yo = (y - mean_c) * (inv * g_ref[...]) + b_ref[...]

        if has_residual:
            yo = yo + r_ref[0].astype(jnp.float32)
        if relu:
            yo = jnp.maximum(yo, 0.0)
        out_ref[0] = yo.astype(out_ref.dtype)               # bf16 activation writeback

    return kernel


def _head_kernel(x_ref, w_ref, b_ref, out_ref):
    """AdaptiveAvgPool2d((1,1)) + flatten + Linear, one sample per grid step."""
    x = x_ref[0].astype(jnp.float32)            # (P, Cp)
    P = x.shape[0]
    xm = jnp.sum(x, axis=0, keepdims=True) * (1.0 / P)       # (1, Cp) global average pool
    y = jnp.dot(xm, w_ref[...], preferred_element_type=jnp.float32) + b_ref[...]
    out_ref[0] = y.astype(out_ref.dtype)


# ----------------------------------------------------------------------------
# Pallas wrappers
# ----------------------------------------------------------------------------
def conv_gn_pallas(patches, layer, *, relu, residual=None, eps=1e-5):
    """patches: (N, P, Kp) bf16 -> (N, P, Cp) bf16 = ReLU(GN(patches @ W) [+ res])."""
    N, P, Kp = patches.shape
    Cp = layer["cout_pad"]
    G = layer["gn_groups"]

    in_specs = [
        pl.BlockSpec((1, P, Kp), lambda n: (n, 0, 0)),
        pl.BlockSpec((Kp, Cp), lambda n: (0, 0)),
        pl.BlockSpec((1, Cp), lambda n: (0, 0)),
        pl.BlockSpec((1, Cp), lambda n: (0, 0)),
        pl.BlockSpec((Cp, G), lambda n: (0, 0)),
        pl.BlockSpec((G, Cp), lambda n: (0, 0)),
    ]
    args = [patches, layer["w_mat"], layer["gamma"], layer["beta"],
            layer["m"], layer["mt"]]
    if residual is not None:
        in_specs.append(pl.BlockSpec((1, P, Cp), lambda n: (n, 0, 0)))
        args.append(residual)

    kernel = _make_conv_gn_kernel(layer["cg"], eps, relu, residual is not None)
    return pl.pallas_call(
        kernel,
        grid=(N,),
        in_specs=in_specs,
        out_specs=pl.BlockSpec((1, P, Cp), lambda n: (n, 0, 0)),
        out_shape=jax.ShapeDtypeStruct((N, P, Cp), jnp.bfloat16),
        compiler_params=pltpu.CompilerParams(
            dimension_semantics=("parallel",),
            vmem_limit_bytes=_VMEM_LIMIT),
    )(*args)


def head_pallas(feat_nhwc, w_pad, b_pad, num_classes):
    """feat: (N, H, W, Cp) bf16 -> (N, num_classes) f32 via fused pool + linear."""
    N, H, W, Cp = feat_nhwc.shape
    P = H * W
    NCp = w_pad.shape[1]
    x = feat_nhwc.reshape(N, P, Cp)
    out = pl.pallas_call(
        _head_kernel,
        grid=(N,),
        in_specs=[
            pl.BlockSpec((1, P, Cp), lambda n: (n, 0, 0)),
            pl.BlockSpec((Cp, NCp), lambda n: (0, 0)),
            pl.BlockSpec((1, NCp), lambda n: (0, 0)),
        ],
        out_specs=pl.BlockSpec((1, 1, NCp), lambda n: (n, 0, 0)),
        out_shape=jax.ShapeDtypeStruct((N, 1, NCp), jnp.float32),
        compiler_params=pltpu.CompilerParams(
            dimension_semantics=("parallel",),
            vmem_limit_bytes=_VMEM_LIMIT),
    )(x, w_pad, b_pad)
    return out[:, 0, :num_classes]


# ----------------------------------------------------------------------------
# Glue: im2col + weight reshapes
# ----------------------------------------------------------------------------
def im2col(x, kh, kw, stride, padding, dilation=1):
    """x: (N, H, W, C) -> patches (N, Ho*Wo, kh*kw*C), plus Ho, Wo. Keeps dtype (bf16)."""
    N, H, W, C = x.shape
    if padding > 0:
        x = jnp.pad(x, ((0, 0), (padding, padding), (padding, padding), (0, 0)))
    Hp, Wp = H + 2 * padding, W + 2 * padding
    Ho = (Hp - dilation * (kh - 1) - 1) // stride + 1
    Wo = (Wp - dilation * (kw - 1) - 1) // stride + 1
    cols = []
    for i in range(kh):
        for j in range(kw):
            sl = x[:,
                   i * dilation: i * dilation + stride * (Ho - 1) + 1: stride,
                   j * dilation: j * dilation + stride * (Wo - 1) + 1: stride, :]
            cols.append(sl)
    patches = jnp.concatenate(cols, axis=-1) if len(cols) > 1 else cols[0]
    return patches.reshape(N, Ho * Wo, kh * kw * C), Ho, Wo


def conv_weight_to_matrix(w, cin_seen, cout_pad):
    """PyTorch conv weight (Cout, Cin, kh, kw) -> padded bf16 (Kp, Cp) matching im2col order."""
    Cout, Cin, kh, kw = w.shape
    wt = jnp.transpose(w, (2, 3, 1, 0))                               # (kh, kw, Cin, Cout)
    wt = jnp.pad(wt, ((0, 0), (0, 0), (0, cin_seen - Cin), (0, cout_pad - Cout)))
    K = kh * kw * cin_seen
    k_pad = _rup(K, LANE)
    wm = wt.reshape(K, cout_pad)
    if k_pad != K:
        wm = jnp.pad(wm, ((0, k_pad - K), (0, 0)))
    return wm.astype(jnp.bfloat16), k_pad


def apply_conv_gn(x_nhwc, layer, *, relu, residual=None):
    N = x_nhwc.shape[0]
    k = layer["ksize"]
    patches, Ho, Wo = im2col(x_nhwc, k, k, layer["stride"], layer["padding"],
                             layer["dilation"])
    K = patches.shape[-1]
    if layer["k_pad"] != K:                                  # pad reduction dim to 128 multiple
        patches = jnp.pad(patches, ((0, 0), (0, 0), (0, layer["k_pad"] - K)))
    res_flat = None
    if residual is not None:
        res_flat = residual.reshape(N, Ho * Wo, residual.shape[-1])
    out = conv_gn_pallas(patches, layer, relu=relu, residual=res_flat)
    return out.reshape(N, Ho, Wo, layer["cout_pad"])


def bottleneck_forward(x_nhwc, block):
    """Matches BottleneckBlock.forward (conv1/relu, conv2/relu, conv3, +shortcut, relu)."""
    out = apply_conv_gn(x_nhwc, block["conv1"], relu=True)
    out = apply_conv_gn(out, block["conv2"], relu=True)
    if block["shortcut"] is not None:
        shortcut = apply_conv_gn(x_nhwc, block["shortcut"], relu=False)
    else:
        shortcut = x_nhwc
    # conv3 + GN fused with residual add and final ReLU
    return apply_conv_gn(out, block["conv3"], relu=True, residual=shortcut)


def resnet_forward(x_nchw, params):
    """ResNet.forward: stem -> res2 -> res3 -> avgpool -> linear. Returns {'linear': y}."""
    assert x_nchw.ndim == 4
    x = jnp.transpose(x_nchw, (0, 2, 3, 1)).astype(jnp.bfloat16)   # NCHW -> NHWC, bf16
    x = apply_conv_gn(x, params["stem"], relu=True)                # stem = conv+GN+ReLU
    for stage in params["stages"]:                                 # res2, res3
        for block in stage:
            x = bottleneck_forward(x, block)
    y = head_pallas(x, params["linear_wmat"], params["linear_b2"],
                    params["num_classes"])                         # avgpool + flatten + linear
    return {"linear": y}
    # TODO(synk): `freeze()` / out_features bookkeeping are training/introspection-only
    # and do not affect the forward compute, so they are not reproduced.


# ----------------------------------------------------------------------------
# Deterministic parameter construction (c2_msra_fill-style init)
# ----------------------------------------------------------------------------
def _msra_fill(key, cout, cin, k):
    fan_out = cout * k * k
    std = (2.0 / fan_out) ** 0.5
    return jax.random.normal(key, (cout, cin, k, k), jnp.float32) * std


def make_conv_layer(key, cin, cout, ksize, stride, padding, gn_groups,
                    dilation=1, cin_seen=None):
    # cin_seen = channel count the layer actually sees (lane-padded for interior layers).
    if cin_seen is None:
        cin_seen = _rup(cin, LANE)
    w = _msra_fill(key, cout, cin, ksize)
    cout_pad = _rup(cout, LANE)
    w_mat, k_pad = conv_weight_to_matrix(w, cin_seen, cout_pad)
    # GroupNorm affine params, zero-padded (padded channels stay exactly zero).
    gamma = jnp.zeros((1, cout_pad), jnp.float32).at[0, :cout].set(1.0)
    beta = jnp.zeros((1, cout_pad), jnp.float32)
    # Hoisted group-membership matrices (channel -> group); padded channels map nowhere.
    cg = cout // gn_groups
    m = ((jnp.arange(cout_pad)[:, None] // cg)
         == jnp.arange(gn_groups)[None, :]).astype(jnp.float32)      # (Cp, G)
    mt = jnp.transpose(m)                                            # (G, Cp)
    return dict(
        w_mat=w_mat, gamma=gamma, beta=beta, m=m, mt=mt,
        ksize=ksize, stride=stride, padding=padding, dilation=dilation,
        gn_groups=gn_groups, cg=cg, cout=cout, cout_pad=cout_pad, k_pad=k_pad,
    )


def make_bottleneck(key, cin, cout, bottleneck, stride, gn_groups,
                    stride_in_1x1=False, dilation=1):
    k1, k2, k3, k4 = jax.random.split(key, 4)
    s1, s3 = (stride, 1) if stride_in_1x1 else (1, stride)
    shortcut = None
    if cin != cout:
        shortcut = make_conv_layer(k4, cin, cout, 1, stride, 0, gn_groups)
    return dict(
        conv1=make_conv_layer(k1, cin, bottleneck, 1, s1, 0, gn_groups),
        conv2=make_conv_layer(k2, bottleneck, bottleneck, 3, s3,
                              dilation * 1, gn_groups, dilation=dilation),
        conv3=make_conv_layer(k3, bottleneck, cout, 1, 1, 0, gn_groups),
        shortcut=shortcut,
    )


def build_params(key, in_channels, num_classes):
    ks = jax.random.split(key, 6)
    # Stem sees the raw (unpadded) input channels.
    stem = make_conv_layer(ks[0], in_channels, 8, 3, 1, 1, gn_groups=2,
                           cin_seen=in_channels)
    res2 = [make_bottleneck(ks[1], 8, 16, bottleneck=8, stride=1, gn_groups=2)]
    res3 = [make_bottleneck(ks[2], 16, 32, bottleneck=8, stride=2, gn_groups=4)]
    final_c = 32
    cp = _rup(final_c, LANE)
    ncp = _rup(num_classes, LANE)
    linear_w = jax.random.normal(ks[3], (num_classes, final_c), jnp.float32) * 0.01
    linear_b = jax.random.normal(ks[4], (num_classes,), jnp.float32) * 0.01
    w_pad = jnp.zeros((cp, ncp), jnp.float32).at[:final_c, :num_classes].set(
        jnp.transpose(linear_w))
    b_pad = jnp.zeros((1, ncp), jnp.float32).at[0, :num_classes].set(linear_b)
    return dict(stem=stem, stages=[res2, res3],
                linear_wmat=w_pad, linear_b2=b_pad, num_classes=num_classes)


# ----------------------------------------------------------------------------
if __name__ == "__main__":
    key = jax.random.PRNGKey(0)
    kp, kx = jax.random.split(key)

    N, C, H, W = 2, 4, 16, 16          # small NCHW input
    num_classes = 10
    params = build_params(kp, C, num_classes)
    x = jax.random.normal(kx, (N, C, H, W), jnp.float32)

    out = resnet_forward(x, params)
    y = jax.block_until_ready(out["linear"])
    assert y.shape == (N, num_classes), y.shape
    assert bool(jnp.all(jnp.isfinite(y)))
    print("KERNEL_OK")
</pallas_src>

<mosaic_0001>
module attributes {stable_mosaic.version = 11 : i64} {
  func.func @kernel(%arg0: i32, %arg1: memref<1x256x128xbf16, #tpu.memory_space<vmem>>, %arg2: memref<128x128xbf16, #tpu.memory_space<vmem>>, %arg3: memref<1x128xf32, #tpu.memory_space<vmem>>, %arg4: memref<1x128xf32, #tpu.memory_space<vmem>>, %arg5: memref<128x2xf32, #tpu.memory_space<vmem>>, %arg6: memref<2x128xf32, #tpu.memory_space<vmem>>, %arg7: memref<1x256x128xbf16, #tpu.memory_space<vmem>>) attributes {dimension_semantics = [#tpu.dimension_semantics<parallel>], iteration_bounds = array<i64: 2>, scalar_prefetch = 0 : i64, scratch_operands = 0 : i64, tpu.core_type = #tpu.core_type<tc>, window_params = [{transform_indices = @transform_0, window_bounds = array<i64: 1, 256, 128>}, {pipeline_mode = #tpu.pipeline_mode<synchronous>, transform_indices = @transform_1, window_bounds = array<i64: 128, 128>}, {pipeline_mode = #tpu.pipeline_mode<synchronous>, transform_indices = @transform_2, window_bounds = array<i64: 1, 128>}, {pipeline_mode = #tpu.pipeline_mode<synchronous>, transform_indices = @transform_3, window_bounds = array<i64: 1, 128>}, {pipeline_mode = #tpu.pipeline_mode<synchronous>, transform_indices = @transform_4, window_bounds = array<i64: 128, 2>}, {pipeline_mode = #tpu.pipeline_mode<synchronous>, transform_indices = @transform_5, window_bounds = array<i64: 2, 128>}, {transform_indices = @transform_6, window_bounds = array<i64: 1, 256, 128>}]} {
    %c0 = arith.constant 0 : index
    %c0_0 = arith.constant 0 : index
    %c0_1 = arith.constant 0 : index
    %0 = vector.load %arg1[%c0, %c0_0, %c0_1] : memref<1x256x128xbf16, #tpu.memory_space<vmem>>, vector<1x256x128xbf16>
    %1 = vector.shape_cast %0 : vector<1x256x128xbf16> to vector<256x128xbf16>
    %c0_2 = arith.constant 0 : index
    %c0_3 = arith.constant 0 : index
    %2 = vector.load %arg2[%c0_2, %c0_3] : memref<128x128xbf16, #tpu.memory_space<vmem>>, vector<128x128xbf16>
    %cst = arith.constant dense<0.000000e+00> : vector<256x128xf32>
    %3 = tpu.matmul %1, %2, %cst {dimension_numbers = #tpu.dot_dimension_numbers<[1], [0], [0], [1], [0, 0, 1, 1], [], []>} : vector<256x128xbf16>, vector<128x128xbf16>, vector<256x128xf32> -> vector<256x128xf32>
    %cst_4 = arith.constant dense<0.000000e+00> : vector<128xf32>
    %4 = vector.multi_reduction <add>, %3, %cst_4 [0] : vector<256x128xf32> to vector<128xf32>
    %5 = vector.shape_cast %4 : vector<128xf32> to vector<1x128xf32>
    %6 = arith.mulf %3, %3 : vector<256x128xf32>
    %cst_5 = arith.constant dense<0.000000e+00> : vector<128xf32>
    %7 = vector.multi_reduction <add>, %6, %cst_5 [0] : vector<256x128xf32> to vector<128xf32>
    %8 = vector.shape_cast %7 : vector<128xf32> to vector<1x128xf32>
    %c0_6 = arith.constant 0 : index
    %c0_7 = arith.constant 0 : index
    %9 = vector.load %arg5[%c0_6, %c0_7] : memref<128x2xf32, #tpu.memory_space<vmem>>, vector<128x2xf32>
    %cst_8 = arith.constant dense<0.000000e+00> : vector<1x2xf32>
    %10 = tpu.matmul %5, %9, %cst_8 {dimension_numbers = #tpu.dot_dimension_numbers<[1], [0], [0], [1], [0, 0, 1, 1], [], []>} : vector<1x128xf32>, vector<128x2xf32>, vector<1x2xf32> -> vector<1x2xf32>
    %c0_9 = arith.constant 0 : index
    %c0_10 = arith.constant 0 : index
    %11 = vector.load %arg5[%c0_9, %c0_10] : memref<128x2xf32, #tpu.memory_space<vmem>>, vector<128x2xf32>
    %cst_11 = arith.constant dense<0.000000e+00> : vector<1x2xf32>
    %12 = tpu.matmul %8, %11, %cst_11 {dimension_numbers = #tpu.dot_dimension_numbers<[1], [0], [0], [1], [0, 0, 1, 1], [], []>} : vector<1x128xf32>, vector<128x2xf32>, vector<1x2xf32> -> vector<1x2xf32>
    %cst_12 = arith.constant 1.024000e+03 : f32
    %13 = vector.broadcast %cst_12 : f32 to vector<1x2xf32>
    %14 = arith.divf %10, %13 : vector<1x2xf32>
    %cst_13 = arith.constant 1.024000e+03 : f32
    %15 = vector.broadcast %cst_13 : f32 to vector<1x2xf32>
    %16 = arith.divf %12, %15 : vector<1x2xf32>
    %17 = arith.mulf %14, %14 : vector<1x2xf32>
    %18 = arith.subf %16, %17 : vector<1x2xf32>
    %cst_14 = arith.constant 0.000000e+00 : f32
    %19 = vector.broadcast %cst_14 : f32 to vector<1x2xf32>
    %20 = arith.maximumf %18, %19 : vector<1x2xf32>
    %c0_15 = arith.constant 0 : index
    %c0_16 = arith.constant 0 : index
    %21 = vector.load %arg6[%c0_15, %c0_16] : memref<2x128xf32, #tpu.memory_space<vmem>>, vector<2x128xf32>
    %cst_17 = arith.constant dense<0.000000e+00> : vector<1x128xf32>
    %22 = tpu.matmul %14, %21, %cst_17 {dimension_numbers = #tpu.dot_dimension_numbers<[1], [0], [0], [1], [0, 0, 1, 1], [], []>} : vector<1x2xf32>, vector<2x128xf32>, vector<1x128xf32> -> vector<1x128xf32>
    %c0_18 = arith.constant 0 : index
    %c0_19 = arith.constant 0 : index
    %23 = vector.load %arg6[%c0_18, %c0_19] : memref<2x128xf32, #tpu.memory_space<vmem>>, vector<2x128xf32>
    %cst_20 = arith.constant dense<0.000000e+00> : vector<1x128xf32>
    %24 = tpu.matmul %20, %23, %cst_20 {dimension_numbers = #tpu.dot_dimension_numbers<[1], [0], [0], [1], [0, 0, 1, 1], [], []>} : vector<1x2xf32>, vector<2x128xf32>, vector<1x128xf32> -> vector<1x128xf32>
    %cst_21 = arith.constant 9.99999974E-6 : f32
    %25 = vector.broadcast %cst_21 : f32 to vector<1x128xf32>
    %26 = arith.addf %24, %25 : vector<1x128xf32>
    %27 = math.rsqrt %26 : vector<1x128xf32>
    %28 = vector.broadcast %22 : vector<1x128xf32> to vector<256x128xf32>
    %29 = arith.subf %3, %28 : vector<256x128xf32>
    %c0_22 = arith.constant 0 : index
    %c0_23 = arith.constant 0 : index
    %30 = vector.load %arg3[%c0_22, %c0_23] : memref<1x128xf32, #tpu.memory_space<vmem>>, vector<1x128xf32>
    %31 = arith.mulf %27, %30 : vector<1x128xf32>
    %32 = vector.broadcast %31 : vector<1x128xf32> to vector<256x128xf32>
    %33 = arith.mulf %29, %32 : vector<256x128xf32>
    %c0_24 = arith.constant 0 : index
    %c0_25 = arith.constant 0 : index
    %34 = vector.load %arg4[%c0_24, %c0_25] : memref<1x128xf32, #tpu.memory_space<vmem>>, vector<1x128xf32>
    %35 = vector.broadcast %34 : vector<1x128xf32> to vector<256x128xf32>
    %36 = arith.addf %33, %35 : vector<256x128xf32>
    %cst_26 = arith.constant 0.000000e+00 : f32
    %37 = vector.broadcast %cst_26 : f32 to vector<256x128xf32>
    %38 = arith.maximumf %36, %37 : vector<256x128xf32>
    %39 = arith.truncf %38 : vector<256x128xf32> to vector<256x128xbf16>
    %c0_27 = arith.constant 0 : index
    %c0_28 = arith.constant 0 : index
    %c0_29 = arith.constant 0 : index
    %40 = vector.load %arg7[%c0_27, %c0_28, %c0_29] : memref<1x256x128xbf16, #tpu.memory_space<vmem>>, vector<1x256x128xbf16>
    %41 = vector.shape_cast %40 : vector<1x256x128xbf16> to vector<256x128xbf16>
    %42 = vector.shape_cast %39 : vector<256x128xbf16> to vector<1x256x128xbf16>
    tpu.vector_store %arg7[%c0_27, %c0_28, %c0_29], %42 {strides = array<i32>} : memref<1x256x128xbf16, #tpu.memory_space<vmem>>, vector<1x256x128xbf16>,
    return
  }
  func.func @transform_0(%arg0: i32) -> (i32, i32, i32) {
    %c0_i32 = arith.constant 0 : i32
    %c0_i32_0 = arith.constant 0 : i32
    %c0_i32_1 = arith.constant 0 : i32
    return %arg0, %c0_i32, %c0_i32_0 : i32, i32, i32
  }
  func.func @transform_1(%arg0: i32) -> (i32, i32) {
    %c0_i32 = arith.constant 0 : i32
    %c0_i32_0 = arith.constant 0 : i32
    %c0_i32_1 = arith.constant 0 : i32
    return %c0_i32, %c0_i32_0 : i32, i32
  }
  func.func @transform_2(%arg0: i32) -> (i32, i32) {
    %c0_i32 = arith.constant 0 : i32
    %c0_i32_0 = arith.constant 0 : i32
    %c0_i32_1 = arith.constant 0 : i32
    return %c0_i32, %c0_i32_0 : i32, i32
  }
  func.func @transform_3(%arg0: i32) -> (i32, i32) {
    %c0_i32 = arith.constant 0 : i32
    %c0_i32_0 = arith.constant 0 : i32
    %c0_i32_1 = arith.constant 0 : i32
    return %c0_i32, %c0_i32_0 : i32, i32
  }
  func.func @transform_4(%arg0: i32) -> (i32, i32) {
    %c0_i32 = arith.constant 0 : i32
    %c0_i32_0 = arith.constant 0 : i32
    %c0_i32_1 = arith.constant 0 : i32
    return %c0_i32, %c0_i32_0 : i32, i32
  }
  func.func @transform_5(%arg0: i32) -> (i32, i32) {
    %c0_i32 = arith.constant 0 : i32
    %c0_i32_0 = arith.constant 0 : i32
    %c0_i32_1 = arith.constant 0 : i32
    return %c0_i32, %c0_i32_0 : i32, i32
  }
  func.func @transform_6(%arg0: i32) -> (i32, i32, i32) {
    %c0_i32 = arith.constant 0 : i32
    %c0_i32_0 = arith.constant 0 : i32
    %c0_i32_1 = arith.constant 0 : i32
    return %arg0, %c0_i32, %c0_i32_0 : i32, i32, i32
  }
}

</mosaic_0001>

<bundles_post_ra>
// kernel: tpu_custom_call.1
= control target key start
LH: loop header
LB: loop body
LE: loop exit
PB: predicated region body
PF: predicated region fallthrough
CT: control target
= control target key end

     0   :  { %11 = vsyncpa [#allocation3], 0  ;;  %s3134_s0 = inlined_call_operand.hbm [shape: bf16[2,256,128], index: 0, kind: input, shape index: {}]   ;;  %s3135_s1 = inlined_call_operand.hbm [shape: bf16[128,128], index: 1, kind: input, shape index: {}]   ;;  %s3136_s2 = inlined_call_operand.hbm [shape: f32[1,128], index: 2, kind: input, shape index: {}]   ;;  %s3137_s3 = inlined_call_operand.hbm [shape: f32[1,128], index: 3, kind: input, shape index: {}]   ;;  %s3138_s4 = inlined_call_operand.hbm [shape: f32[128,2], index: 4, kind: input, shape index: {}]   ;;  %s3139_s5 = inlined_call_operand.hbm [shape: f32[2,128], index: 5, kind: input, shape index: {}]   ;;  %s3140_s6 = inlined_call_operand.hbm [shape: bf16[2,256,128], index: 6, kind: output, shape index: {}]  }
   0x1   :  { %13 = vsyncpa [#allocation3 + $0x1], 0 }
   0x2   :  { %14 = vsyncpa [#allocation6], 0 }
   0x3   :  { %15 = vsyncpa [#allocation9], 0 }
   0x4   :  { %16 = vsyncpa [#allocation12], 0 }
   0x5   :  { %17 = vsyncpa [#allocation4], 0 }
   0x6   :  { %19 = vsyncpa [#allocation4 + $0x1], 0  ;;  %s2437_s21 = smov 0   ;;  %s2439_s22 = smov 0  }
   0x7   :  { %s2441_s23 = smov 0   ;;  %s2443_s24 = smov 0  }
   0x8 LB: > { %s2386_s25 = smov [#allocation5]   ;;  %s2458_s27 = sadd.s32 4294967295, %s2384_s24   ;;  %s2384_s24 = sphi %s2443_s24, %s3165_s24   ;;  %s2380_s23 = sphi %s2441_s23, %s3164_s23   ;;  %s2376_s22 = sphi %s2439_s22, %s3163_s22   ;;  %s2372_s21 = sphi %s2437_s21, %s3162_s21  }
   0x9   : > { %s199_s26 = sshll.u32 %s2386_s25, 4  ;;  %p1553_p0 = scmp.ge.s32.totalorder %s2384_s24, 1  ;;  %s2463_s26 = int_to_ptr.vmem [resolvable:$true] %s199_s26 }
   0xa   : > { %p3141_p1 = scmp.eq.s32.totalorder %s2458_s27, 0  ;;  %p187_p2 = scmp.lt.s32.totalorder %s2384_s24, 3 }
   0xb   : > { %s2387_s29 = smov [#allocation8]   ;;  %s2388_s8 = smov [#allocation7]  }
   0xc   : > { %p2465_p3 = pnand %p1553_p0, %p187_p2  ;;  %s224_s30 = sshll.u32 %s2387_s29, 4  ;;  %s2478_s30 = int_to_ptr.vmem [resolvable:$true] %s224_s30 }
   0xd   : > { %s213_s9 = sshll.u32 %s2388_s8, 4  ;;  %s2136_s12 = scalar_lea.hbm %s3135_s1, 1024  ;;  %s2480_s9 = int_to_ptr.vmem [resolvable:$true] %s213_s9 }
   0xe   : > { %s3144_s28 = scalar_select %p2465_p3, 1, 0 }
   0xf   : > { %p2028_p5 = pneg %p2465_p3  ;;  %p2137_p7 = scmp.ne.s32.totalorder %s3135_s1, %s2136_s12 }
  0x10   : > { %p2143_p11 = scmp.lt.u32.totalorder %s2136_s12, %s3135_s1 }
  0x11   : > { %p2474_p6 = pnand %p2028_p5, %p3141_p1 }
  0x13   : > { %p2490_p8 = pneg %p2474_p6 }
  0x15   : > { %p2139_p9 = pnand %p2490_p8, %p2137_p7 }
  0x17   : > { %p2140_p10 = pneg %p2139_p9 }
  0x19   : > { %p2145_p12 = pnand %p2143_p11, %p2140_p10 }
  0x1b   : > { %2148 = shalt.err (!%p2145_p12)
}
  0x1c   : > { %s2149_s18 = scalar_lea.vmem %s2463_s26, 1024  ;;  %p2157_p5 = scmp.lt.s32.totalorder %s2463_s26, %s2463_s26 }
  0x1d   : > { %p2150_p13 = scmp.ne.s32.totalorder %s2463_s26, %s2149_s18  ;;  %p2158_p4 = scmp.lt.s32.totalorder %s2149_s18, %s2149_s18 }
  0x1f   : > { %p2152_p0 = pnand %p2150_p13, %p2490_p8  ;;  %p2159_p7 = por %p2158_p4, %p2157_p5 }
  0x21   : > { %p2153_p2 = pneg %p2152_p0 }
  0x23   : > { %p2160_p9 = pnand %p2159_p7, %p2153_p2 }
  0x25   : > { %2163 = shalt.err (!%p2160_p9)
}
  0x26   : > { %s2389_s19 = smov 64   ;;  %s2390_s20 = smov 4  }
  0x27   : > { %2031 = dma.hbm_to_vmem [thread:$0]  (!%p2474_p6), %s3135_s1, 1024, %s2463_s26, [#allocation6], %s2389_s19, %s2389_s19, %s2390_s20  }
  0x28   : > { %s2164_s11 = scalar_lea.hbm %s3137_s3, 16 }
  0x29   : > { %p2165_p4 = scmp.ne.s32.totalorder %s3137_s3, %s2164_s11  ;;  %p2171_p12 = scmp.lt.u32.totalorder %s2164_s11, %s3137_s3 }
  0x2b   : > { %p2167_p10 = pnand %p2165_p4, %p2490_p8 }
  0x2d   : > { %p2168_p11 = pneg %p2167_p10 }
  0x2f   : > { %p2173_p13 = pnand %p2171_p12, %p2168_p11 }
  0x31   : > { %2176 = shalt.err (!%p2173_p13)
}
  0x32   : > { %s2177_s26 = scalar_lea.vmem %s2478_s30, 16  ;;  %s2184_s17 = scalar_lea.vmem %s2478_s30, 32 }
  0x33   : > { %p2178_p0 = scmp.ne.s32.totalorder %s2478_s30, %s2177_s26  ;;  %p2185_p7 = scmp.lt.s32.totalorder %s2478_s30, %s2478_s30 }
  0x34   : > { %p2186_p9 = scmp.lt.s32.totalorder %s2184_s17, %s2177_s26 }
  0x35   : > { %p2180_p2 = pnand %p2178_p0, %p2490_p8 }
  0x36   : > { %p2187_p4 = por %p2186_p9, %p2185_p7 }
  0x37   : > { %p2181_p5 = pneg %p2180_p2 }
  0x39   : > { %p2188_p10 = pnand %p2187_p4, %p2181_p5 }
  0x3b   : > { %2191 = shalt.err (!%p2188_p10)
}
  0x3c   : > { %2037 = dma.hbm_to_vmem [thread:$0]  (!%p2474_p6), %s3137_s3, 16, %s2478_s30, [#allocation9]  }
  0x3d   : > { %s2192_s10 = scalar_lea.hbm %s3136_s2, 16 }
  0x3e   : > { %p2193_p11 = scmp.ne.s32.totalorder %s3136_s2, %s2192_s10  ;;  %p2199_p0 = scmp.lt.u32.totalorder %s2192_s10, %s3136_s2 }
  0x40   : > { %p2195_p12 = pnand %p2193_p11, %p2490_p8 }
  0x42   : > { %p2196_p13 = pneg %p2195_p12 }
  0x44   : > { %p2201_p2 = pnand %p2199_p0, %p2196_p13 }
  0x46   : > { %2204 = shalt.err (!%p2201_p2)
}
  0x47   : > { %s2205_s30 = scalar_lea.vmem %s2480_s9, 16  ;;  %s2212_s16 = scalar_lea.vmem %s2480_s9, 32 }
  0x48   : > { %p2206_p5 = scmp.ne.s32.totalorder %s2480_s9, %s2205_s30  ;;  %p2213_p4 = scmp.lt.s32.totalorder %s2480_s9, %s2480_s9 }
  0x49   : > { %p2214_p10 = scmp.lt.s32.totalorder %s2212_s16, %s2205_s30 }
  0x4a   : > { %p2208_p7 = pnand %p2206_p5, %p2490_p8 }
  0x4b   : > { %p2215_p11 = por %p2214_p10, %p2213_p4 }
  0x4c   : > { %p2209_p9 = pneg %p2208_p7 }
  0x4e   : > { %p2216_p12 = pnand %p2215_p11, %p2209_p9 }
  0x50   : > { %2219 = shalt.err (!%p2216_p12)
}
  0x51   : > { %2034 = dma.hbm_to_vmem [thread:$0]  (!%p2474_p6), %s3136_s2, 16, %s2480_s9, [#allocation6]  }
  0x52   : > { %s2391_s18 = smov [#allocation10]   ;;  %s2220_s10 = scalar_lea.hbm %s3138_s4, 2048 }
  0x53   : > { %s234_s25 = sshll.u32 %s2391_s18, 4  ;;  %p2221_p13 = scmp.ne.s32.totalorder %s3138_s4, %s2220_s10  ;;  %s235_s25 = int_to_ptr.vmem [resolvable:$true] %s234_s25 }
  0x54   : > { %p2227_p5 = scmp.lt.u32.totalorder %s2220_s10, %s3138_s4 }
  0x55   : > { %p2223_p0 = pnand %p2221_p13, %p2490_p8 }
  0x57   : > { %p2224_p2 = pneg %p2223_p0 }
  0x59   : > { %p2229_p7 = pnand %p2227_p5, %p2224_p2 }
  0x5b   : > { %2232 = shalt.err (!%p2229_p7)
}
  0x5c   : > { %s2233_s9 = scalar_lea.vmem %s235_s25, 2048  ;;  %p2241_p11 = scmp.lt.s32.totalorder %s235_s25, %s235_s25 }
  0x5d   : > { %p2234_p9 = scmp.ne.s32.totalorder %s235_s25, %s2233_s9  ;;  %p2242_p12 = scmp.lt.s32.totalorder %s2233_s9, %s2233_s9 }
  0x5f   : > { %p2236_p4 = pnand %p2234_p9, %p2490_p8  ;;  %p2243_p1 = por %p2242_p12, %p2241_p11 }
  0x61   : > { %p2237_p10 = pneg %p2236_p4 }
  0x63   : > { %p2244_p3 = pnand %p2243_p1, %p2237_p10 }
  0x65   : > { %2247 = shalt.err (!%p2244_p3)
}
  0x66   : > { %s2392_s30 = smov 128   ;;  %s2393_s16 = smov 8  }
  0x67   : > { %2040 = dma.hbm_to_vmem [thread:$0]  (!%p2474_p6), %s3138_s4, 2048, %s235_s25, [#allocation9], %s2392_s30, %s2392_s30, %s2393_s16  }
  0x68   : > { %s2394_s18 = smov [#allocation11]   ;;  %s2248_s11 = scalar_lea.hbm %s3139_s5, 32 }
  0x69   : > { %s248_s29 = sshll.u32 %s2394_s18, 4  ;;  %p2249_p1 = scmp.ne.s32.totalorder %s3139_s5, %s2248_s11  ;;  %s249_s29 = int_to_ptr.vmem [resolvable:$true] %s248_s29 }
  0x6a   : > { %p2255_p0 = scmp.lt.u32.totalorder %s2248_s11, %s3139_s5 }
  0x6b   : > { %p2251_p3 = pnand %p2249_p1, %p2490_p8 }
  0x6d   : > { %p2252_p13 = pneg %p2251_p3 }
  0x6f   : > { %p2257_p2 = pnand %p2255_p0, %p2252_p13 }
  0x71   : > { %2260 = shalt.err (!%p2257_p2)
}
  0x72   : > { %s2261_s25 = scalar_lea.vmem %s249_s29, 32  ;;  %p2269_p4 = scmp.lt.s32.totalorder %s249_s29, %s249_s29 }
  0x73   : > { %p2262_p5 = scmp.ne.s32.totalorder %s249_s29, %s2261_s25  ;;  %p2270_p10 = scmp.lt.s32.totalorder %s2261_s25, %s2261_s25 }
  0x75   : > { %p2264_p7 = pnand %p2262_p5, %p2490_p8  ;;  %p2271_p11 = por %p2270_p10, %p2269_p4 }
  0x77   : > { %p2265_p9 = pneg %p2264_p7 }
  0x79   : > { %p2272_p12 = pnand %p2271_p11, %p2265_p9 }
  0x7b   : > { %2275 = shalt.err (!%p2272_p12)
}
  0x7c   : > { %2043 = dma.hbm_to_vmem [thread:$0]  (!%p2474_p6), %s3139_s5, 32, %s249_s29, [#allocation12]  }
  0x7d   : > { %s1552_s15 = sadd.s32 4294967294, %s2384_s24   ;;  %s2600_s7 = sadd.s32 1, %s2384_s24  }
  0x7e   : > { %s32_s26 = sadd.s32 1, %s2380_s23  ;;  %s29_s17 = ssub.s32 %s2384_s24, %s2600_s7 }
  0x7f   : > { %p39_p8 = scmp.ne.s32.totalorder %s2380_s23, %s2376_s22  ;;  %p30_p1 = scmp.eq.s32.totalorder %s29_s17, 0 }
  0x80   : > { %p40_p3 = scmp.eq.s32.totalorder %s2384_s24, 0  ;;  %p45_p13 = scmp.ne.s32.totalorder %s2376_s22, %s2372_s21 }
  0x81   : > { %p174_p0 = scmp.eq.s32.totalorder %s2458_s27, 1  ;;  %p3147_p5 = scmp.eq.s32.totalorder %s2458_s27, 0 }
  0x82   : > { %s2612_s18 = scalar_select %p30_p1, %s2380_s23, %s32_s26  }
  0x83   : > { %p41_p2 = por %p40_p3, %p39_p8  ;;  %p2616_p7 = por %p3147_p5, %p45_p13 }
  0x84   : > { %p2620_p6 = por %p174_p0, %p39_p8  ;;  %p180_p9 = scmp.eq.s32.totalorder %s1552_s15, 1 }
  0x85   : > { %p2057_p4 = scmp.lt.s32.totalorder %s2384_s24, 2  ;;  %s259_s10 = sand.u32 1, %s2380_s23  }
  0x86   : > { %s3149_s29 = scalar_select %p2620_p6, 1, 0 }
  0x87   : > { %p2626_p10 = por %p180_p9, %p45_p13  ;;  %s1560_s12 = sshll.u32 %s259_s10, 7 }
  0x88   : > { %s1637_s13 = sshll.u32 %s2384_s24, 11  ;;  %s263_s30 = scalar_lea.vmem [#allocation2], %s1560_s12 }
  0x89   : > { %s3150_s11 = scalar_select %p2626_p10, 1, 0 }
  0x8a   : > { %s2634_s25 = scalar_lea.hbm %s3134_s0, %s1637_s13  ;;  %s270_s16 = sshll.u32 %s263_s30, 4  ;;  %s2640_s16 = int_to_ptr.vmem [resolvable:$true] %s270_s16 }
  0x8b   : > { %p2636_p11 = pnand %p2057_p4, %p41_p2  ;;  %s2642_s26 = scalar_lea.sflag [#allocation3], %s259_s10 }
  0x8c   : > { %s2276_s17 = scalar_lea.hbm %s2634_s25, 2048  ;;  %s2281_s14 = scalar_lea.hbm %s3134_s0, 4096 }
  0x8d   : > { %p2277_p12 = scmp.ne.s32.totalorder %s2634_s25, %s2276_s17  ;;  %p2278_p8 = pneg %p2636_p11 }
  0x8e   : > { %p2282_p13 = scmp.lt.u32.totalorder %s2634_s25, %s3134_s0  ;;  %p2283_p0 = scmp.lt.u32.totalorder %s2281_s14, %s2276_s17 }
  0x8f   : > { %p2279_p1 = pnand %p2278_p8, %p2277_p12  ;;  %p2285_p5 = scmp.lt.u32.totalorder %s2276_s17, %s2634_s25 }
  0x90   : > { %p2284_p2 = por %p2283_p0, %p2282_p13 }
  0x91   : > { %p2280_p3 = pneg %p2279_p1 }
  0x92   : > { %p2286_p9 = por %p2285_p5, %p2284_p2 }
  0x94   : > { %p2287_p4 = pnand %p2286_p9, %p2280_p3 }
  0x96   : > { %2290 = shalt.err (!%p2287_p4)
}
  0x97   : > { %s2291_s10 = scalar_lea.vmem %s2640_s16, 2048  ;;  %s2395_s12 = smov [#allocation2]  }
  0x98   : > { %p2292_p12 = scmp.ne.s32.totalorder %s2640_s16, %s2291_s10  ;;  %s2296_s13 = sshll.u32 %s2395_s12, 4  ;;  %s2297_s13 = int_to_ptr.vmem [resolvable:$false] %s2296_s13 }
  0x99   : > { %s2298_s9 = scalar_lea.vmem %s2297_s13, 4096  ;;  %p2299_p6 = scmp.lt.s32.totalorder %s2640_s16, %s2297_s13 }
  0x9a   : > { %p2294_p1 = pnand %p2292_p12, %p2278_p8  ;;  %p2300_p13 = scmp.lt.s32.totalorder %s2298_s9, %s2291_s10 }
  0x9c   : > { %p2295_p10 = pneg %p2294_p1  ;;  %p2301_p0 = por %p2300_p13, %p2299_p6 }
  0x9e   : > { %p2302_p2 = pnand %p2301_p0, %p2295_p10 }
  0xa0   : > { %2305 = shalt.err (!%p2302_p2)
}
  0xa1   : > { %2047 = dma.hbm_to_vmem [thread:$0]  (!%p2636_p11), %s2634_s25, 2048, %s2640_s16, %s2642_s26, %s2389_s19, %s2389_s19, %s2390_s20  }
  0xa2   : > { %p3152_p8 = scmp.ne.s32.totalorder %s3144_s28, 0 }
  0xa3   : > { %s2676_s17 = sand.u32 (!%p3152_p8), 1, %s2376_s22  }
  0xa4   : > { %282 = sbr.rel (%p3152_p8) target bundleno = 1031 (0x407), region = 44  ;;  %s1564_s14 = sshll.u32 (!%p3152_p8), %s2676_s17, 7 }
  0xa5   : > { %s285_s30 = scalar_lea.sflag (!%p3152_p8), [#allocation3], %s2676_s17  ;;  %s2682_s15 = scalar_lea.vmem (!%p3152_p8), [#allocation2], %s1564_s14 }
  0xab   : > { %2351 = dma.done.wait (%p2616_p7), %s285_s30, 2048  }
  0xac   : > { %2353 = vsyncadd (%p2616_p7), %s285_s30, 4294965248  ;;  %p3153_p6 = scmp.eq.s32.totalorder %s2458_s27, 0 }
  0xae   : > { %2355 = dma.done.wait (%p3153_p6), [#allocation6], 1040   ;;  %p3154_p10 = pmov %p3153_p6 }
  0xaf   : > { %p3155_p11 = pmov %p3153_p6 }
  0xb0   : > { %2357 = vsyncadd (%p3154_p10), [#allocation6], 4294966256 }
  0xb1   : > { %2359 = dma.done.wait (%p3155_p11), [#allocation9], 2064   ;;  %p3156_p3 = pmov %p3153_p6 }
  0xb3   : > { %2361 = vsyncadd (%p3156_p3), [#allocation9], 4294965232  ;;  %p3157_p5 = pmov %p3156_p3 }
  0xb4   : > { %p3158_p9 = pmov %p3156_p3 }
  0xb5   : > { %2363 = dma.done.wait (%p3157_p5), [#allocation12], 32  }
  0xb6   : > { %2365 = vsyncadd (%p3158_p9), [#allocation12], 4294967264  ;;  %v2110_v0 = vld [vmem:[#allocation5] sm:$0xff]   ;;  %v2111_v1 = vld [vmem:[#allocation5 + $0x8] sm:$0xff]   ;;  %v2396_v27 = vmov 0.0|0.0   ;;  %vm2397_vm0 = vmmov 0  }
  0xb7   : > { %1828 = vmatprep.subr.bf16.mxu0 %v2110_v0  ;;  %v2112_v2 = vld [vmem:[#allocation5 + $0x10] sm:$0xff]   ;;  %v2113_v3 = vld [vmem:[#allocation5 + $0x18] sm:$0xff]   ;;  %v2118_v4 = vld [vmem:[%s2682_s15] sm:$0xff]   ;;  %1956 = vmatprep.subr.bf16.mxu1 %v2396_v27  ;;  %v2398_v49 = vmov 0.0   ;;  %vm964_vm1 = vcmask 1041408   ;;  %vm960_vm2 = vcmask 15360  }
  0xb8   : > { %1829 = vmatpush3.bf16.msra.mxu0 %v2110_v0  ;;  %1844 = vmatprep.mubr.bf16.mxu0 %v2118_v4  ;;  %v2114_v5 = vld [vmem:[#allocation5 + $0x20] sm:$0xff]   ;;  %v2115_v6 = vld [vmem:[#allocation5 + $0x28] sm:$0xff]   ;;  %v2116_v7 = vld [vmem:[#allocation5 + $0x30] sm:$0xff]   ;;  %s1670_s28 = sshll.u32 %s2458_s27, 11  ;;  %s3066_s19 = scalar_lea.vmem [#allocation13], %s1564_s14 }
  0xb9   : > { %1830 = vmatprep.subr.bf16.mxu0 %v2111_v1  ;;  %v2117_v8 = vld [vmem:[#allocation5 + $0x38] sm:$0xff]   ;;  %v2119_v9 = vld [vmem:[%s2682_s15 + $0x8] sm:$0xff]   ;;  %v2120_v10 = vld [vmem:[%s2682_s15 + $0x10] sm:$0xff]   ;;  %1908 = vmatprep.mubr.msk.f32.mxu1 %vm2397_vm0, %v2398_v49  ;;  %s1431_s20 = sshll.u32 %s3066_s19, 4  ;;  %s3076_s25 = scalar_lea.hbm %s3140_s6, %s1670_s28  ;;  %s3078_s20 = int_to_ptr.vmem [resolvable:$true] %s1431_s20 }
  0xba   : > { %v2121_v11 = vld [vmem:[%s2682_s15 + $0x18] sm:$0xff]   ;;  %v2122_v12 = vld [vmem:[%s2682_s15 + $0x20] sm:$0xff]   ;;  %v2123_v13 = vld [vmem:[%s2682_s15 + $0x28] sm:$0xff]   ;;  %s1418_s16 = scalar_lea.sflag [#allocation4], %s2676_s17  ;;  %s2306_s26 = scalar_lea.vmem %s3078_s20, 2048 }
  0xbb   : > { %v2124_v14 = vld [vmem:[%s2682_s15 + $0x30] sm:$0xff]   ;;  %v2125_v15 = vld [vmem:[%s2682_s15 + $0x38] sm:$0xff]   ;;  %v2126_v16 = vld [vmem:[%s2682_s15 + $0x40] sm:$0xff]   ;;  %p2307_p7 = scmp.ne.s32.totalorder %s3078_s20, %s2306_s26  ;;  %p3159_p4 = scmp.ne.s32.totalorder %s3149_s29, 0 }
  0xbc   : > { %1831 = vmatpush3.bf16.msra.mxu0 %v2111_v1  ;;  %v2127_v17 = vld [vmem:[%s2682_s15 + $0x48] sm:$0xff]   ;;  %v2128_v18 = vld [vmem:[%s2682_s15 + $0x50] sm:$0xff]   ;;  %v2129_v19 = vld [vmem:[%s2682_s15 + $0x58] sm:$0xff]   ;;  %s2399_s10 = smov [#allocation13]  }
  0xbd   : > { %1832 = vmatprep.subr.bf16.mxu0 %v2112_v2  ;;  %v2130_v20 = vld [vmem:[%s2682_s15 + $0x60] sm:$0xff]   ;;  %v2131_v21 = vld [vmem:[%s2682_s15 + $0x68] sm:$0xff]   ;;  %v2132_v22 = vld [vmem:[%s2682_s15 + $0x70] sm:$0xff]   ;;  %p2308_p12 = pnand %p2307_p7, %p3159_p4  ;;  %s2310_s12 = sshll.u32 %s2399_s10, 4  ;;  %s2311_s12 = int_to_ptr.vmem [resolvable:$false] %s2310_s12 }
  0xbe   : > { %v2133_v23 = vld [vmem:[%s2682_s15 + $0x78] sm:$0xff]   ;;  %v797_v24 = vld [vmem:[#allocation10] sm:$0xff]  ;;  %v798_v25 = vld [vmem:[#allocation10 + $0x8] sm:$0xff]  ;;  %s2312_s13 = scalar_lea.vmem %s2311_s12, 4096  ;;  %p2313_p13 = scmp.lt.s32.totalorder %s3078_s20, %s2311_s12 }
  0xbf   : > { %v2716_v26 = vpack.c.bf16 %v798_v25, %v797_v24  ;;  %v799_v28 = vld [vmem:[#allocation10 + $0x10] sm:$0xff]  ;;  %v800_v29 = vld [vmem:[#allocation10 + $0x18] sm:$0xff]  ;;  %v801_v31 = vld [vmem:[#allocation10 + $0x20] sm:$0xff]  ;;  %p2309_p1 = pneg %p2308_p12  ;;  %p2314_p0 = scmp.lt.s32.totalorder %s2312_s13, %s2306_s26 }
  0xc0   : > { %1833 = vmatpush3.bf16.msra.mxu0 %v2112_v2  ;;  %v2721_v30 = vpack.c.bf16 %v800_v29, %v799_v28  ;;  %v802_v32 = vld [vmem:[#allocation10 + $0x28] sm:$0xff]  ;;  %v803_v34 = vld [vmem:[#allocation10 + $0x30] sm:$0xff]  ;;  %v804_v35 = vld [vmem:[#allocation10 + $0x38] sm:$0xff] }
  0xc1   : > { %1834 = vmatprep.subr.bf16.mxu0 %v2113_v3  ;;  %1958 = vmatpush3.bf16.msra.mxu1 %v2716_v26  ;;  %v2725_v33 = vpack.c.bf16 %v802_v32, %v801_v31  ;;  %v2729_v36 = vpack.c.bf16 %v804_v35, %v803_v34  ;;  %v805_v37 = vld [vmem:[#allocation10 + $0x40] sm:$0xff]  ;;  %v806_v38 = vld [vmem:[#allocation10 + $0x48] sm:$0xff]  ;;  %v807_v40 = vld [vmem:[#allocation10 + $0x50] sm:$0xff]  ;;  %p2315_p2 = por %p2314_p0, %p2313_p13 }
  0xc2   : > { %1959 = vmatprep.subr.bf16.mxu1 %v2396_v27  ;;  %v2733_v39 = vpack.c.bf16 %v806_v38, %v805_v37  ;;  %v808_v41 = vld [vmem:[#allocation10 + $0x58] sm:$0xff]  ;;  %v809_v43 = vld [vmem:[#allocation10 + $0x60] sm:$0xff]  ;;  %v810_v44 = vld [vmem:[#allocation10 + $0x68] sm:$0xff] }
  0xc3   : > { %v2737_v42 = vpack.c.bf16 %v808_v41, %v807_v40  ;;  %v2741_v45 = vpack.c.bf16 %v810_v44, %v809_v43  ;;  %v811_v46 = vld [vmem:[#allocation10 + $0x70] sm:$0xff]  ;;  %v812_v47 = vld [vmem:[#allocation10 + $0x78] sm:$0xff]  ;;  %p2316_p8 = pnand %p2315_p2, %p2309_p1 }
  0xc4   : > { %1835 = vmatpush3.bf16.msra.mxu0 %v2113_v3  ;;  %v2745_v48 = vpack.c.bf16 %v812_v47, %v811_v46 }
  0xc5   : > { %1836 = vmatprep.subr.bf16.mxu0 %v2114_v5  ;;  %1961 = vmatpush3.bf16.msra.mxu1 %v2721_v30 }
  0xc6   : > { %1962 = vmatprep.subr.bf16.mxu1 %v2396_v27 }
  0xc8   : > { %1837 = vmatpush3.bf16.msra.mxu0 %v2114_v5 }
  0xc9   : > { %1838 = vmatprep.subr.bf16.mxu0 %v2115_v6  ;;  %1964 = vmatpush3.bf16.msra.mxu1 %v2725_v33 }
  0xca   : > { %1965 = vmatprep.subr.bf16.mxu1 %v2396_v27 }
  0xcc   : > { %1839 = vmatpush3.bf16.msra.mxu0 %v2115_v6 }
  0xcd   : > { %1840 = vmatprep.subr.bf16.mxu0 %v2116_v7  ;;  %1967 = vmatpush3.bf16.msra.mxu1 %v2729_v36 }
  0xce   : > { %1968 = vmatprep.subr.bf16.mxu1 %v2396_v27 }
  0xd0   : > { %1841 = vmatpush3.bf16.msra.mxu0 %v2116_v7 }
  0xd1   : > { %1842 = vmatprep.subr.bf16.mxu0 %v2117_v8  ;;  %1970 = vmatpush3.bf16.msra.mxu1 %v2733_v39 }
  0xd2   : > { %1971 = vmatprep.subr.bf16.mxu1 %v2396_v27 }
  0xd4   : > { %1843 = vmatpush3.bf16.msra.mxu0 %v2117_v8 }
  0xd5   : > { %1973 = vmatpush3.bf16.msra.mxu1 %v2737_v42 }
  0xd6   : > { %1974 = vmatprep.subr.bf16.mxu1 %v2396_v27 }
  0xd7   : > { %1845 = vmatmul.mubr.bf16.vlgmr.msra.gmra.mrb[0].mxu0 %v2119_v9 }
  0xd8   : > { %1848 = vmatprep.mubr.bf16.mxu0 %v2120_v10 }
  0xd9   : > { %1976 = vmatpush3.bf16.msra.mxu1 %v2741_v45 }
  0xda   : > { %1977 = vmatprep.subr.bf16.mxu1 %v2396_v27 }
  0xdd   : > { %1979 = vmatpush3.bf16.msra.mxu1 %v2745_v48 }
  0xde   : > { %1980 = vmatprep.subr.bf16.mxu1 %v2396_v27 }
  0xdf   : > { %1849 = vmatmul.mubr.bf16.gmra.mrb[4].mxu0 %v2121_v11 }
  0xe0   : > { %1852 = vmatprep.mubr.bf16.mxu0 %v2122_v12 }
  0xe7   : > { %1853 = vmatmul.mubr.bf16.gmra.mrb[8].mxu0 %v2123_v13 }
  0xe8   : > { %1856 = vmatprep.mubr.bf16.mxu0 %v2124_v14 }
  0xef   : > { %1857 = vmatmul.mubr.bf16.gmra.mrb[12].mxu0 %v2125_v15 }
  0xf0   : > { %1860 = vmatprep.mubr.bf16.mxu0 %v2126_v16 }
  0xf7   : > { %1861 = vmatmul.mubr.bf16.gmra.mrb[16].mxu0 %v2127_v17 }
  0xf8   : > { %1864 = vmatprep.mubr.bf16.mxu0 %v2128_v18 }
  0xff   : > { %1865 = vmatmul.mubr.bf16.gmra.mrb[20].mxu0 %v2129_v19 }
 0x100   : > { %1868 = vmatprep.mubr.bf16.mxu0 %v2130_v20 }
 0x107   : > { %1869 = vmatmul.mubr.bf16.gmra.mrb[24].mxu0 %v2131_v21 }
 0x108   : > { %1872 = vmatprep.mubr.bf16.mxu0 %v2132_v22 }
 0x10f   : > { %1873 = vmatmul.mubr.bf16.gmra.mrb[28].mxu0 %v2133_v23 }
 0x1aa   : > { %v2751_v50 = vpop.f32.mrb[0].mxu0 }
 0x1ab   : > { %v2753_v51 = vpop.f32.mrb[1].mxu0  ;;  %v730_v57 = vmul.f32 %v2751_v50, %v2751_v50 }
 0x1ac   : > { %v2755_v52 = vpop.f32.mrb[2].mxu0  ;;  %v728_v54 = vmul.f32 %v2753_v51, %v2753_v51 }
 0x1ad   : > { %v2757_v53 = vpop.f32.mrb[3].mxu0  ;;  %v731_v60 = vmul.f32 %v2755_v52, %v2755_v52 }
 0x1ae   : > { %v691_v55 = vadd.f32 %v2757_v53, %v2753_v51  ;;  %v729_v56 = vmul.f32 %v2757_v53, %v2757_v53 }
 0x1b0   : > { %v692_v58 = vadd.f32 %v2751_v50, %v691_v55  ;;  %v760_v59 = vadd.f32 %v729_v56, %v728_v54 }
 0x1b2   : > { %v761_v61 = vadd.f32 %v760_v59, %v730_v57  ;;  %v2770_v62 = vpop.f32.mrb[4].mxu0  ;;  %v693_v63 = vadd.f32 %v2755_v52, %v692_v58 }
 0x1b3   : > { %v2773_v0 = vpop.f32.mrb[5].mxu0  ;;  %v734_v9 = vmul.f32 %v2770_v62, %v2770_v62 }
 0x1b4   : > { %v694_v1 = vadd.f32 %v693_v63, %v2773_v0  ;;  %v732_v2 = vmul.f32 %v2773_v0, %v2773_v0  ;;  %v762_v3 = vadd.f32 %v761_v61, %v731_v60  ;;  %v2778_v4 = vpop.f32.mrb[6].mxu0 }
 0x1b5   : > { %v2780_v5 = vpop.f32.mrb[7].mxu0  ;;  %v735_v12 = vmul.f32 %v2778_v4, %v2778_v4 }
 0x1b6   : > { %v763_v6 = vadd.f32 %v762_v3, %v732_v2  ;;  %v695_v7 = vadd.f32 %v694_v1, %v2780_v5  ;;  %v733_v8 = vmul.f32 %v2780_v5, %v2780_v5 }
 0x1b8   : > { %v696_v10 = vadd.f32 %v2770_v62, %v695_v7  ;;  %v764_v11 = vadd.f32 %v763_v6, %v733_v8 }
 0x1ba   : > { %v765_v13 = vadd.f32 %v764_v11, %v734_v9  ;;  %v2790_v14 = vpop.f32.mrb[8].mxu0  ;;  %v697_v15 = vadd.f32 %v2778_v4, %v696_v10 }
 0x1bb   : > { %v2793_v16 = vpop.f32.mrb[9].mxu0  ;;  %v738_v25 = vmul.f32 %v2790_v14, %v2790_v14 }
 0x1bc   : > { %v698_v17 = vadd.f32 %v697_v15, %v2793_v16  ;;  %v736_v18 = vmul.f32 %v2793_v16, %v2793_v16  ;;  %v766_v19 = vadd.f32 %v765_v13, %v735_v12  ;;  %v2798_v20 = vpop.f32.mrb[10].mxu0 }
 0x1bd   : > { %v2800_v21 = vpop.f32.mrb[11].mxu0  ;;  %v739_v31 = vmul.f32 %v2798_v20, %v2798_v20 }
 0x1be   : > { %v767_v22 = vadd.f32 %v766_v19, %v736_v18  ;;  %v699_v23 = vadd.f32 %v698_v17, %v2800_v21  ;;  %v737_v24 = vmul.f32 %v2800_v21, %v2800_v21 }
 0x1c0   : > { %v700_v28 = vadd.f32 %v2790_v14, %v699_v23  ;;  %v768_v29 = vadd.f32 %v767_v22, %v737_v24 }
 0x1c2   : > { %v769_v32 = vadd.f32 %v768_v29, %v738_v25  ;;  %v2810_v34 = vpop.f32.mrb[12].mxu0  ;;  %v701_v35 = vadd.f32 %v2798_v20, %v700_v28 }
 0x1c3   : > { %v2813_v37 = vpop.f32.mrb[13].mxu0  ;;  %v742_v55 = vmul.f32 %v2810_v34, %v2810_v34 }
 0x1c4   : > { %v702_v38 = vadd.f32 %v701_v35, %v2813_v37  ;;  %v740_v40 = vmul.f32 %v2813_v37, %v2813_v37  ;;  %v770_v41 = vadd.f32 %v769_v32, %v739_v31  ;;  %v2818_v43 = vpop.f32.mrb[14].mxu0 }
 0x1c5   : > { %v2820_v44 = vpop.f32.mrb[15].mxu0  ;;  %v743_v58 = vmul.f32 %v2818_v43, %v2818_v43 }
 0x1c6   : > { %v771_v46 = vadd.f32 %v770_v41, %v740_v40  ;;  %v703_v47 = vadd.f32 %v702_v38, %v2820_v44  ;;  %v741_v54 = vmul.f32 %v2820_v44, %v2820_v44 }
 0x1c8   : > { %v704_v56 = vadd.f32 %v2810_v34, %v703_v47  ;;  %v772_v57 = vadd.f32 %v771_v46, %v741_v54 }
 0x1ca   : > { %v773_v59 = vadd.f32 %v772_v57, %v742_v55  ;;  %v2830_v60 = vpop.f32.mrb[16].mxu0  ;;  %v705_v61 = vadd.f32 %v2818_v43, %v704_v56 }
 0x1cb   : > { %v2833_v63 = vpop.f32.mrb[17].mxu0  ;;  %v746_v11 = vmul.f32 %v2830_v60, %v2830_v60 }
 0x1cc   : > { %v706_v1 = vadd.f32 %v705_v61, %v2833_v63  ;;  %v744_v2 = vmul.f32 %v2833_v63, %v2833_v63  ;;  %v774_v3 = vadd.f32 %v773_v59, %v743_v58  ;;  %v2838_v6 = vpop.f32.mrb[18].mxu0 }
 0x1cd   : > { %v2840_v7 = vpop.f32.mrb[19].mxu0  ;;  %v747_v15 = vmul.f32 %v2838_v6, %v2838_v6 }
 0x1ce   : > { %v775_v8 = vadd.f32 %v774_v3, %v744_v2  ;;  %v707_v9 = vadd.f32 %v706_v1, %v2840_v7  ;;  %v745_v10 = vmul.f32 %v2840_v7, %v2840_v7 }
 0x1d0   : > { %v708_v12 = vadd.f32 %v2830_v60, %v707_v9  ;;  %v776_v13 = vadd.f32 %v775_v8, %v745_v10 }
 0x1d2   : > { %v777_v17 = vadd.f32 %v776_v13, %v746_v11  ;;  %v2850_v18 = vpop.f32.mrb[20].mxu0  ;;  %v709_v19 = vadd.f32 %v2838_v6, %v708_v12 }
 0x1d3   : > { %v2853_v22 = vpop.f32.mrb[21].mxu0  ;;  %v750_v38 = vmul.f32 %v2850_v18, %v2850_v18 }
 0x1d4   : > { %v710_v23 = vadd.f32 %v709_v19, %v2853_v22  ;;  %v748_v24 = vmul.f32 %v2853_v22, %v2853_v22  ;;  %v778_v25 = vadd.f32 %v777_v17, %v747_v15  ;;  %v2858_v28 = vpop.f32.mrb[22].mxu0 }
 0x1d5   : > { %v2860_v29 = vpop.f32.mrb[23].mxu0  ;;  %v751_v46 = vmul.f32 %v2858_v28, %v2858_v28 }
 0x1d6   : > { %v779_v31 = vadd.f32 %v778_v25, %v748_v24  ;;  %v711_v32 = vadd.f32 %v710_v23, %v2860_v29  ;;  %v749_v35 = vmul.f32 %v2860_v29, %v2860_v29 }
 0x1d8   : > { %v712_v40 = vadd.f32 %v2850_v18, %v711_v32  ;;  %v780_v41 = vadd.f32 %v779_v31, %v749_v35 }
 0x1da   : > { %v781_v47 = vadd.f32 %v780_v41, %v750_v38  ;;  %v2870_v54 = vpop.f32.mrb[24].mxu0  ;;  %v713_v55 = vadd.f32 %v2858_v28, %v712_v40 }
 0x1db   : > { %v2873_v56 = vpop.f32.mrb[25].mxu0  ;;  %v754_v9 = vmul.f32 %v2870_v54, %v2870_v54 }
 0x1dc   : > { %v714_v57 = vadd.f32 %v713_v55, %v2873_v56  ;;  %v752_v58 = vmul.f32 %v2873_v56, %v2873_v56  ;;  %v782_v59 = vadd.f32 %v781_v47, %v751_v46  ;;  %v2878_v61 = vpop.f32.mrb[26].mxu0 }
 0x1dd   : > { %v2880_v1 = vpop.f32.mrb[27].mxu0  ;;  %v755_v12 = vmul.f32 %v2878_v61, %v2878_v61 }
 0x1de   : > { %v783_v2 = vadd.f32 %v782_v59, %v752_v58  ;;  %v715_v3 = vadd.f32 %v714_v57, %v2880_v1  ;;  %v753_v8 = vmul.f32 %v2880_v1, %v2880_v1 }
 0x1e0   : > { %v716_v10 = vadd.f32 %v2870_v54, %v715_v3  ;;  %v784_v11 = vadd.f32 %v783_v2, %v753_v8 }
 0x1e2   : > { %v785_v13 = vadd.f32 %v784_v11, %v754_v9  ;;  %v2890_v15 = vpop.f32.mrb[28].mxu0  ;;  %v717_v17 = vadd.f32 %v2878_v61, %v716_v10 }
 0x1e3   : > { %v2893_v19 = vpop.f32.mrb[29].mxu0  ;;  %v758_v41 = vmul.f32 %v2890_v15, %v2890_v15 }
 0x1e4   : > { %v718_v23 = vadd.f32 %v717_v17, %v2893_v19  ;;  %v756_v24 = vmul.f32 %v2893_v19, %v2893_v19  ;;  %v786_v25 = vadd.f32 %v785_v13, %v755_v12  ;;  %v2898_v31 = vpop.f32.mrb[30].mxu0 }
 0x1e5   : > { %v2900_v32 = vpop.f32.mrb[31].mxu0  ;;  %v759_v55 = vmul.f32 %v2898_v31, %v2898_v31 }
 0x1e6   : > { %v787_v35 = vadd.f32 %v786_v25, %v756_v24  ;;  %v719_v38 = vadd.f32 %v718_v23, %v2900_v32  ;;  %v757_v40 = vmul.f32 %v2900_v32, %v2900_v32 }
 0x1e8   : > { %v720_v46 = vadd.f32 %v2890_v15, %v719_v38  ;;  %v788_v47 = vadd.f32 %v787_v35, %v757_v40  ;;  %v1112_v38 = vlaneseq }
 0x1ea   : > { %v721_v57 = vadd.f32 %v2898_v31, %v720_v46  ;;  %v789_v58 = vadd.f32 %v788_v47, %v758_v41  ;;  %v1113_v40 = vshrl.u32 %v1112_v38, 7 }
 0x1ec   : > { %v722_v59 = vrot.slane %v721_v57, 4  ;;  %v790_v2 = vadd.f32 %v789_v58, %v759_v55  ;;  %v1114_v41 = vsub.s32 0, %v1113_v40  ;;  %v1599_v40 = vld [vmem:[#allocation8] ss:$0 sm:$0xff] }
 0x1ee   : > { %v723_v3 = vadd.f32 %v722_v59, %v721_v57  ;;  %v791_v12 = vrot.slane %v790_v2, 4 }
 0x1f0   : > { %v724_v8 = vrot.slane %v723_v3, 2  ;;  %v792_v13 = vadd.f32 %v791_v12, %v790_v2 }
 0x1f2   : > { %v725_v9 = vadd.f32 %v724_v8, %v723_v3 }
 0x1f4   : > { %v726_v10 = vrot.slane %v725_v9, 1 }
 0x1f6   : > { %v727_v11 = vadd.f32 %v726_v10, %v725_v9 }
 0x1f8   : > { %1909 = vmatmul.mubr.f32.vlgmr.msra.gmra.mrb[0].mxu1 %v727_v11 }
 0x1f9   : > { %1982 = vmatpush3.bf16.msra.mxu1 %v2716_v26  ;;  %1943 = vmatprep.mubr.msk.f32.mxu1 %vm2397_vm0, %v2398_v49  ;;  %v793_v26 = vrot.slane %v792_v13, 2 }
 0x1fa   : > { %1983 = vmatprep.subr.bf16.mxu1 %v2396_v27 }
 0x1fd   : > { %1985 = vmatpush3.bf16.msra.mxu1 %v2721_v30  ;;  %v794_v30 = vadd.f32 %v793_v26, %v792_v13 }
 0x1fe   : > { %1986 = vmatprep.subr.bf16.mxu1 %v2396_v27 }
 0x201   : > { %1988 = vmatpush3.bf16.msra.mxu1 %v2725_v33  ;;  %v795_v33 = vrot.slane %v794_v30, 1 }
 0x202   : > { %1989 = vmatprep.subr.bf16.mxu1 %v2396_v27 }
 0x205   : > { %1991 = vmatpush3.bf16.msra.mxu1 %v2729_v36  ;;  %v796_v36 = vadd.f32 %v795_v33, %v794_v30 }
 0x206   : > { %1992 = vmatprep.subr.bf16.mxu1 %v2396_v27 }
 0x209   : > { %1994 = vmatpush3.bf16.msra.mxu1 %v2733_v39  ;;  %v959_v39 = vld [vmem:[#allocation11] sm:$0x3] }
 0x20a   : > { %1995 = vmatprep.subr.bf16.mxu1 %v2396_v27 }
 0x20d   : > { %1997 = vmatpush3.bf16.msra.mxu1 %v2737_v42 }
 0x20e   : > { %1998 = vmatprep.subr.bf16.mxu1 %v2396_v27 }
 0x211   : > { %2000 = vmatpush3.bf16.msra.mxu1 %v2741_v45 }
 0x212   : > { %2001 = vmatprep.subr.bf16.mxu1 %v2396_v27 }
 0x215   : > { %2003 = vmatpush3.bf16.msra.mxu1 %v2745_v48 }
 0x216   : > { %1946 = vmatprep.subr.mxu1 %v2398_v49 }
 0x218   : > { %1944 = vmatmul.mubr.f32.vlgmr.msra.gmra.mrb[2].mxu1 %v796_v36 }
 0x219   : > { %1948 = vmatprep.mubr.msk.f32.mxu1 %vm2397_vm0, %v2398_v49  ;;  %1947 = vmatpush3.msk.msra.mxu1 %vm964_vm1, %v959_v39 }
 0x21a   : > { %1951 = vmatprep.subr.mxu1 %v2398_v49 }
 0x2cb   : > { %v879_v42 = vpop.f32.mrb[0].mxu1 }
 0x2cc   : > { %v954_v45 = vmul.f32 0.0009765625, %v879_v42  ;;  %v1910_v17 = vpop.f32.mrb[1].mxu1 }
 0x2ce   : > { %1949 = vmatmul.mubr.msk.f32.vlgmr.msra.gmra.mrb[4].mxu1 %vm960_vm2, %v954_v45  ;;  %v956_v48 = vmul.f32 %v954_v45, %v954_v45 }
 0x2cf   : > { %1952 = vmatpush3.msk.msra.mxu1 %vm964_vm1, %v959_v39  ;;  %1953 = vmatprep.mubr.msk.f32.mxu1 %vm2397_vm0, %v2398_v49 }
 0x2eb   : > { %v949_v27 = vpop.f32.mrb[2].mxu1 }
 0x2ec   : > { %v955_v23 = vmul.f32 0.0009765625, %v949_v27  ;;  %v1945_v24 = vpop.f32.mrb[3].mxu1 }
 0x2ee   : > { %v957_v25 = vsub.f32 %v955_v23, %v956_v48 }
 0x2f0   : > { %v958_v35 = vmax.f32 %v957_v25, 0.0 }
 0x2f2   : > { %1954 = vmatmul.mubr.msk.f32.vlgmr.msra.gmra.mrb[6].mxu1 %vm960_vm2, %v958_v35 }
 0x3a1   : > { %v1034_v46 = vpop.f32.mrb[4].mxu1 }
 0x3a2   : > { %v2934_v47 = vrot.slane %v1034_v46, %v1114_v41  ;;  %v1950_v55 = vpop.f32.mrb[5].mxu1 }
 0x3a4   : > { %v1116_v57 = vsub.f32 %v2753_v51, %v2934_v47  ;;  %v1117_v49 = vsub.f32 %v2757_v53, %v2934_v47  ;;  %v1118_v58 = vsub.f32 %v2751_v50, %v2934_v47  ;;  %v1119_v59 = vsub.f32 %v2755_v52, %v2934_v47 }
 0x3a5   : > { %v1120_v2 = vsub.f32 %v2773_v0, %v2934_v47  ;;  %v1121_v3 = vsub.f32 %v2780_v5, %v2934_v47  ;;  %v1122_v8 = vsub.f32 %v2770_v62, %v2934_v47  ;;  %v1123_v51 = vsub.f32 %v2778_v4, %v2934_v47 }
 0x3a6   : > { %v1124_v53 = vsub.f32 %v2793_v16, %v2934_v47  ;;  %v1125_v50 = vsub.f32 %v2800_v21, %v2934_v47  ;;  %v1126_v52 = vsub.f32 %v2790_v14, %v2934_v47  ;;  %v1127_v0 = vsub.f32 %v2798_v20, %v2934_v47 }
 0x3a7   : > { %v1128_v5 = vsub.f32 %v2813_v37, %v2934_v47  ;;  %v1129_v62 = vsub.f32 %v2820_v44, %v2934_v47  ;;  %v1130_v4 = vsub.f32 %v2810_v34, %v2934_v47  ;;  %v1131_v16 = vsub.f32 %v2818_v43, %v2934_v47 }
 0x3a8   : > { %v1132_v21 = vsub.f32 %v2833_v63, %v2934_v47  ;;  %v1133_v14 = vsub.f32 %v2840_v7, %v2934_v47  ;;  %v1134_v20 = vsub.f32 %v2830_v60, %v2934_v47  ;;  %v1135_v37 = vsub.f32 %v2838_v6, %v2934_v47 }
 0x3a9   : > { %v1136_v44 = vsub.f32 %v2853_v22, %v2934_v47  ;;  %v1137_v34 = vsub.f32 %v2860_v29, %v2934_v47  ;;  %v1138_v43 = vsub.f32 %v2850_v18, %v2934_v47  ;;  %v1139_v63 = vsub.f32 %v2858_v28, %v2934_v47 }
 0x3aa   : > { %v1140_v7 = vsub.f32 %v2873_v56, %v2934_v47  ;;  %v1141_v60 = vsub.f32 %v2880_v1, %v2934_v47  ;;  %v1142_v6 = vsub.f32 %v2870_v54, %v2934_v47  ;;  %v1143_v22 = vsub.f32 %v2878_v61, %v2934_v47  ;;  %v1148_v54 = vld [vmem:[#allocation7] sm:$0x1] }
 0x3ab   : > { %v1144_v29 = vsub.f32 %v2893_v19, %v2934_v47  ;;  %v1145_v18 = vsub.f32 %v2900_v32, %v2934_v47  ;;  %v1146_v28 = vsub.f32 %v2890_v15, %v2934_v47  ;;  %v1147_v56 = vsub.f32 %v2898_v31, %v2934_v47 }
 0x3c5   : > { %v1107_v9 = vpop.f32.mrb[6].mxu1 }
 0x3c6   : > { %v1108_v1 = vadd.f32 1e-05, %v1107_v9  ;;  %v1955_v10 = vpop.f32.mrb[7].mxu1 }
 0x3c8   : > { %2134 = vrsqrt.f32 %v1108_v1 }
 0x3d2   : > { %v2135_v11 = vpop.eup %2134 }
 0x3d3   : > { %v1149_v12 = vmul.f32 %v2135_v11, %v1148_v54 }
 0x3d5   : > { %v1153_v61 = vrot.slane %v1149_v12, %v1114_v41 }
 0x3d7   : > { %v1154_v13 = vmul.f32 %v1153_v61, %v1116_v57  ;;  %v1155_v26 = vmul.f32 %v1153_v61, %v1117_v49  ;;  %v1156_v19 = vmul.f32 %v1153_v61, %v1118_v58  ;;  %v1157_v30 = vmul.f32 %v1153_v61, %v1119_v59 }
 0x3d8   : > { %v1158_v33 = vmul.f32 %v1153_v61, %v1120_v2  ;;  %v1159_v32 = vmul.f32 %v1153_v61, %v1121_v3  ;;  %v1160_v36 = vmul.f32 %v1153_v61, %v1122_v8  ;;  %v1161_v39 = vmul.f32 %v1153_v61, %v1123_v51 }
 0x3d9   : > { %v1162_v15 = vmul.f32 %v1153_v61, %v1124_v53  ;;  %v1163_v42 = vmul.f32 %v1153_v61, %v1125_v50  ;;  %v1164_v45 = vmul.f32 %v1153_v61, %v1126_v52  ;;  %v1165_v31 = vmul.f32 %v1153_v61, %v1127_v0 }
 0x3da   : > { %v1166_v17 = vmul.f32 %v1153_v61, %v1128_v5  ;;  %v1167_v27 = vmul.f32 %v1153_v61, %v1129_v62  ;;  %v1168_v48 = vmul.f32 %v1153_v61, %v1130_v4  ;;  %v1169_v23 = vmul.f32 %v1153_v61, %v1131_v16 }
 0x3db   : > { %v1170_v24 = vmul.f32 %v1153_v61, %v1132_v21  ;;  %v1171_v25 = vmul.f32 %v1153_v61, %v1133_v14  ;;  %v1172_v35 = vmul.f32 %v1153_v61, %v1134_v20  ;;  %v1173_v38 = vmul.f32 %v1153_v61, %v1135_v37 }
 0x3dc   : > { %v1174_v41 = vmul.f32 %v1153_v61, %v1136_v44  ;;  %v1175_v46 = vmul.f32 %v1153_v61, %v1137_v34  ;;  %v1176_v47 = vmul.f32 %v1153_v61, %v1138_v43  ;;  %v1177_v55 = vmul.f32 %v1153_v61, %v1139_v63 }
 0x3dd   : > { %v1178_v57 = vmul.f32 %v1153_v61, %v1140_v7  ;;  %v1179_v49 = vmul.f32 %v1153_v61, %v1141_v60  ;;  %v1180_v58 = vmul.f32 %v1153_v61, %v1142_v6  ;;  %v1181_v59 = vmul.f32 %v1153_v61, %v1143_v22 }
 0x3de   : > { %v1182_v2 = vmul.f32 %v1153_v61, %v1144_v29  ;;  %v1183_v3 = vmul.f32 %v1153_v61, %v1145_v18  ;;  %v1184_v8 = vmul.f32 %v1153_v61, %v1146_v28  ;;  %v1185_v51 = vmul.f32 %v1153_v61, %v1147_v56 }
 0x3df   : > { %v3000_v53 = vadd.f32 %v1599_v40, %v1154_v13  ;;  %v3002_v50 = vadd.f32 %v1599_v40, %v1155_v26  ;;  %v3004_v52 = vadd.f32 %v1599_v40, %v1156_v19  ;;  %v3006_v0 = vadd.f32 %v1599_v40, %v1157_v30 }
 0x3e0   : > { %v3008_v5 = vadd.f32 %v1599_v40, %v1158_v33  ;;  %v3010_v62 = vadd.f32 %v1599_v40, %v1159_v32  ;;  %v3012_v4 = vadd.f32 %v1599_v40, %v1160_v36  ;;  %v3014_v16 = vadd.f32 %v1599_v40, %v1161_v39 }
 0x3e1   : > { %v3016_v21 = vadd.f32 %v1599_v40, %v1162_v15  ;;  %v3018_v14 = vadd.f32 %v1599_v40, %v1163_v42  ;;  %v3020_v20 = vadd.f32 %v1599_v40, %v1164_v45  ;;  %v1204_v37 = vadd.f32 %v1599_v40, %v1165_v31 }
 0x3e2   : > { %v1205_v44 = vadd.f32 %v1599_v40, %v1166_v17  ;;  %v1206_v34 = vadd.f32 %v1599_v40, %v1167_v27  ;;  %v1207_v43 = vadd.f32 %v1599_v40, %v1168_v48  ;;  %v1208_v63 = vadd.f32 %v1599_v40, %v1169_v23 }
 0x3e3   : > { %v3022_v7 = vadd.f32 %v1599_v40, %v1170_v24  ;;  %v3024_v60 = vadd.f32 %v1599_v40, %v1171_v25  ;;  %v3026_v6 = vadd.f32 %v1599_v40, %v1172_v35  ;;  %v1212_v22 = vadd.f32 %v1599_v40, %v1173_v38 }
 0x3e4   : > { %v1213_v29 = vadd.f32 %v1599_v40, %v1174_v41  ;;  %v1214_v18 = vadd.f32 %v1599_v40, %v1175_v46  ;;  %v1215_v28 = vadd.f32 %v1599_v40, %v1176_v47  ;;  %v1216_v56 = vadd.f32 %v1599_v40, %v1177_v55 }
 0x3e5   : > { %v3028_v9 = vadd.f32 %v1599_v40, %v1178_v57  ;;  %v3030_v1 = vadd.f32 %v1599_v40, %v1179_v49  ;;  %v3032_v10 = vadd.f32 %v1599_v40, %v1180_v58  ;;  %v3034_v54 = vadd.f32 %v1599_v40, %v1181_v59 }
 0x3e6   : > { %v3036_v11 = vadd.f32 %v1599_v40, %v1182_v2  ;;  %v3038_v12 = vadd.f32 %v1599_v40, %v1183_v3  ;;  %v3040_v61 = vadd.f32 %v1599_v40, %v1184_v8  ;;  %v1224_v13 = vadd.f32 %v1599_v40, %v1185_v51 }
 0x3e7   : > { %v1225_v26 = vmax.f32 %v3000_v53, 0.0  ;;  %v1226_v19 = vmax.f32 %v3002_v50, 0.0  ;;  %v1227_v30 = vmax.f32 %v3004_v52, 0.0  ;;  %v1228_v33 = vmax.f32 %v3006_v0, 0.0 }
 0x3e8   : > { %v1229_v32 = vmax.f32 %v3008_v5, 0.0  ;;  %v1230_v36 = vmax.f32 %v3010_v62, 0.0  ;;  %v1231_v39 = vmax.f32 %v3012_v4, 0.0  ;;  %v1232_v15 = vmax.f32 %v3014_v16, 0.0 }
 0x3e9   : > { %v1233_v42 = vmax.f32 %v3016_v21, 0.0  ;;  %v1234_v45 = vmax.f32 %v3018_v14, 0.0  ;;  %v1235_v31 = vmax.f32 %v3020_v20, 0.0  ;;  %v1236_v17 = vmax.f32 %v1204_v37, 0.0 }
 0x3ea   : > { %v1237_v27 = vmax.f32 %v1205_v44, 0.0  ;;  %v1238_v48 = vmax.f32 %v1206_v34, 0.0  ;;  %v1239_v23 = vmax.f32 %v1207_v43, 0.0  ;;  %v1240_v24 = vmax.f32 %v1208_v63, 0.0 }
 0x3eb   : > { %v1241_v25 = vmax.f32 %v3022_v7, 0.0  ;;  %v1242_v35 = vmax.f32 %v3024_v60, 0.0  ;;  %v1243_v38 = vmax.f32 %v3026_v6, 0.0  ;;  %v1244_v40 = vmax.f32 %v1212_v22, 0.0 }
 0x3ec   : > { %v1245_v41 = vmax.f32 %v1213_v29, 0.0  ;;  %v1246_v46 = vmax.f32 %v1214_v18, 0.0  ;;  %v1247_v47 = vmax.f32 %v1215_v28, 0.0  ;;  %v1248_v55 = vmax.f32 %v1216_v56, 0.0 }
 0x3ed   : > { %v1249_v57 = vmax.f32 %v3028_v9, 0.0  ;;  %v1250_v49 = vmax.f32 %v3030_v1, 0.0  ;;  %v1251_v58 = vmax.f32 %v3032_v10, 0.0  ;;  %v1252_v59 = vmax.f32 %v3034_v54, 0.0 }
 0x3ee   : > { %v1253_v2 = vmax.f32 %v3036_v11, 0.0  ;;  %v1254_v3 = vmax.f32 %v3038_v12, 0.0  ;;  %v1255_v8 = vmax.f32 %v3040_v61, 0.0  ;;  %v1256_v51 = vmax.f32 %v1224_v13, 0.0 }
 0x3ef   : > { %v1674_v53 = vpack.c.bf16 %v1226_v19, %v1225_v26  ;;  %v1679_v50 = vpack.c.bf16 %v1228_v33, %v1227_v30  ;;  %v1684_v52 = vpack.c.bf16 %v1230_v36, %v1229_v32  ;;  %v1689_v0 = vpack.c.bf16 %v1232_v15, %v1231_v39 }
 0x3f0   : > { %v1694_v5 = vpack.c.bf16 %v1234_v45, %v1233_v42  ;;  %v1699_v62 = vpack.c.bf16 %v1236_v17, %v1235_v31  ;;  %v1704_v4 = vpack.c.bf16 %v1238_v48, %v1237_v27  ;;  %v1709_v16 = vpack.c.bf16 %v1240_v24, %v1239_v23 }
 0x3f1   : > { %1675 = vst [vmem:[%s3066_s19] sm:$0xff] %v1674_v53   ;;  %1751 = vst [vmem:[%s3066_s19 + $0x8] sm:$0xff] %v1679_v50   ;;  %v1714_v21 = vpack.c.bf16 %v1242_v35, %v1241_v25  ;;  %v1719_v14 = vpack.c.bf16 %v1244_v40, %v1243_v38  ;;  %v1724_v20 = vpack.c.bf16 %v1246_v46, %v1245_v41 }
 0x3f2   : > { %1752 = vst [vmem:[%s3066_s19 + $0x10] sm:$0xff] %v1684_v52   ;;  %1753 = vst [vmem:[%s3066_s19 + $0x18] sm:$0xff] %v1689_v0   ;;  %v1729_v37 = vpack.c.bf16 %v1248_v55, %v1247_v47  ;;  %v1734_v44 = vpack.c.bf16 %v1250_v49, %v1249_v57  ;;  %v1739_v34 = vpack.c.bf16 %v1252_v59, %v1251_v58 }
 0x3f3   : > { %1754 = vst [vmem:[%s3066_s19 + $0x20] sm:$0xff] %v1694_v5   ;;  %1755 = vst [vmem:[%s3066_s19 + $0x28] sm:$0xff] %v1699_v62   ;;  %v1744_v43 = vpack.c.bf16 %v1254_v3, %v1253_v2  ;;  %v1749_v63 = vpack.c.bf16 %v1256_v51, %v1255_v8 }
 0x3f4   : > { %1756 = vst [vmem:[%s3066_s19 + $0x30] sm:$0xff] %v1704_v4   ;;  %1757 = vst [vmem:[%s3066_s19 + $0x38] sm:$0xff] %v1709_v16  }
 0x3f5   : > { %1758 = vst [vmem:[%s3066_s19 + $0x40] sm:$0xff] %v1714_v21   ;;  %1759 = vst [vmem:[%s3066_s19 + $0x48] sm:$0xff] %v1719_v14  }
 0x3f6   : > { %1760 = vst [vmem:[%s3066_s19 + $0x50] sm:$0xff] %v1724_v20   ;;  %1761 = vst [vmem:[%s3066_s19 + $0x58] sm:$0xff] %v1729_v37  }
 0x3f7   : > { %1762 = vst [vmem:[%s3066_s19 + $0x60] sm:$0xff] %v1734_v44   ;;  %1763 = vst [vmem:[%s3066_s19 + $0x68] sm:$0xff] %v1739_v34  }
 0x3f8   : > { %1764 = vst [vmem:[%s3066_s19 + $0x70] sm:$0xff] %v1744_v43   ;;  %1765 = vst [vmem:[%s3066_s19 + $0x78] sm:$0xff] %v1749_v63  }
 0x3f9   : > { %2319 = shalt.err (!%p2316_p8)
}
 0x3fa   : > { %s2320_s9 = scalar_lea.hbm %s3076_s25, 2048  ;;  %s2324_s15 = scalar_lea.hbm %s3140_s6, 4096 }
 0x3fb   : > { %p2321_p6 = scmp.ne.s32.totalorder %s3076_s25, %s2320_s9  ;;  %p2325_p3 = scmp.lt.u32.totalorder %s3076_s25, %s3140_s6 }
 0x3fc   : > { %p2326_p5 = scmp.lt.u32.totalorder %s2324_s15, %s2320_s9  ;;  %p2328_p7 = scmp.lt.u32.totalorder %s2320_s9, %s3076_s25 }
 0x3fd   : > { %p2322_p10 = pnand %p2321_p6, %p3159_p4 }
 0x3fe   : > { %p2327_p9 = por %p2326_p5, %p2325_p3 }
 0x3ff   : > { %p2323_p11 = pneg %p2322_p10 }
 0x400   : > { %p2329_p12 = por %p2328_p7, %p2327_p9 }
 0x402   : > { %p2330_p1 = pnand %p2329_p12, %p2323_p11 }
 0x404   : > { %2333 = shalt.err (!%p2330_p1)
}
 0x405   : > { %s2400_s27 = smov 64   ;;  %s2401_s8 = smov 4  }
 0x406   : > { %2026 = dma.vmem_to_hbm [thread:$0]  (%p3159_p4), %s3078_s20, 2048, %s3076_s25, %s1418_s16, %s2400_s27, %s2400_s27, %s2401_s8  }
 0x407 PF: > { %s1446_s26 = sand.u32 1, %s2372_s21   ;;  %p3160_p13 = scmp.ne.s32.totalorder %s3150_s11, 0 }
 0x408   : > { %p3161_p0 = scmp.ge.s32.totalorder %s2384_s24, 2  ;;  %s1447_s10 = scalar_lea.sflag [#allocation4], %s1446_s26 }
 0x40a   : > { %p2049_p2 = pnand %p3161_p0, %p3160_p13 }
 0x40c   : > { %2367 = dma.done.wait (!%p2049_p2), %s1447_s10, 2048  }
 0x40d   : > { %2369 = vsyncadd (!%p2049_p2), %s1447_s10, 4294965248  ;;  %p22_p8 = scmp.ge.s32.totalorder %s2600_s7, 4   ;;  %s3162_s21 = smov %s2376_s22 }
 0x40e   : > { %s3163_s22 = smov %s2380_s23  ;;  %s3164_s23 = smov %s2612_s18 }
 0x40f   : > { %s3165_s24 = smov %s2600_s7  ;;  %24 = sbr.rel (!%p22_p8) target bundleno = 8 (0x8), region = 109 }
 0x416   :  { %1452 = vsyncpa [#allocation3], 1 }
 0x417   :  { %1454 = vsyncpa [#allocation3 + $0x1], 1 }
 0x418   :  { %1455 = vsyncpa [#allocation6], 1 }
 0x419   :  { %1456 = vsyncpa [#allocation9], 1 }
 0x41a   :  { %1457 = vsyncpa [#allocation12], 1 }
 0x41b   :  { %1458 = vsyncpa [#allocation4], 1 }
 0x41c   :  { %1460 = vsyncpa [#allocation4 + $0x1], 1 }

</bundles_post_ra>
